<compile_context>
chip_gen: v6e
topology: v6e:2x2x1
jax: 0.10.0
libtpu: 0.0.40
codegen_flags: <defaults>
</compile_context>

<pallas_src>
import functools

import jax
import jax.numpy as jnp
from jax import lax
from jax.experimental import pallas as pl
from jax.experimental.pallas import tpu as pltpu


# ---------------------------------------------------------------------------
# Pallas kernel: normalize each row of a [R, L] slab over its last dimension.
# ---------------------------------------------------------------------------
def _row_norm_kernel(x_ref, g_ref, b_ref, o_ref, *, eps):
    x = x_ref[...].astype(jnp.float32)                       # (tile_r, L)
    mean = jnp.mean(x, axis=-1, keepdims=True)               # XLU lane reduce
    centered = x - mean
    var = jnp.mean(centered * centered, axis=-1, keepdims=True)
    inv = lax.rsqrt(var + eps)                                # EUP rsqrt (free slot)
    y = centered * inv
    y = y * g_ref[...].astype(jnp.float32) + b_ref[...].astype(jnp.float32)
    o_ref[...] = y.astype(o_ref.dtype)


def pallas_row_norm(x2: jax.Array,
                    gamma_rows: jax.Array,
                    beta_rows: jax.Array,
                    eps: float = 1e-5) -> jax.Array:
    """Normalize every row of x2 [R, L] over the last dim; y = xhat*g + b."""
    R, L = x2.shape
    gamma_rows = gamma_rows.reshape(R, 1).astype(jnp.float32)
    beta_rows = beta_rows.reshape(R, 1).astype(jnp.float32)

    # Byte-budgeted row tiling: target ~2 MiB per block so that
    # 2 buffers x (in + out) x tile_bytes stays far below every generation's
    # default scoped VMEM (v5e 16 MiB, v6e/v7x 32 MiB).
    bytes_per_row = max(1, L * x2.dtype.itemsize)
    target_block_bytes = 2 * 1024 * 1024
    tile_r = target_block_bytes // bytes_per_row
    if tile_r >= R:
        tile_r = R                      # single full-extent block (always legal)
    else:
        tile_r = max(8, (tile_r // 8) * 8)   # (8,128) rule: sublane dim % 8 == 0

    grid = (pl.cdiv(R, tile_r),)

    return pl.pallas_call(
        functools.partial(_row_norm_kernel, eps=eps),
        out_shape=jax.ShapeDtypeStruct((R, L), x2.dtype),
        grid=grid,
        in_specs=[
            pl.BlockSpec((tile_r, L), lambda i: (i, 0)),   # lane-dense data slab
            pl.BlockSpec((tile_r, 1), lambda i: (i, 0)),   # per-row gamma
            pl.BlockSpec((tile_r, 1), lambda i: (i, 0)),   # per-row beta
        ],
        out_specs=pl.BlockSpec((tile_r, L), lambda i: (i, 0)),
        compiler_params=pltpu.CompilerParams(
            dimension_semantics=("parallel",),             # shards across v7x TCs
        ),
    )(x2, gamma_rows, beta_rows)


# ---------------------------------------------------------------------------
# Module equivalents.
# ---------------------------------------------------------------------------
class Identity:
    """JAX equivalent of torch_utils.encoders.Identity — pure pass-through."""

    def __init__(self, *args, **kwargs):
        del args, kwargs
        self.length_reduction = 1

    def __call__(self, x, features_lens=None):
        # Review: the best identity "kernel" is no kernel — no HBM read/write,
        # no launch overhead. Just hand the array back.
        if features_lens is not None:
            return (x, features_lens)
        return x


class Normalization:
    """JAX/Pallas equivalent of torch_utils.encoders.Normalization."""

    def __init__(self, norm_type, nary, input_size, set_affine=None, eps=1e-5):
        self.nary = nary
        self.eps = float(eps)
        self.input_size = int(input_size)
        self.norm_type = norm_type if norm_type else 'none'

        if self.norm_type == 'batch_norm':
            if nary not in (1, 2):
                raise ValueError(
                    'Unknown nary for {} normalization'.format(norm_type))
            affine = True if set_affine is None else bool(set_affine)
        elif self.norm_type == 'instance_norm':
            if nary not in (1, 2):
                raise ValueError(
                    'Unknown nary for {} normalization'.format(norm_type))
            affine = False if set_affine is None else bool(set_affine)
        elif self.norm_type == 'none':
            affine = False
            self.batch_norm = Identity()
        else:
            raise ValueError(
                'Unknown normalization type {}.\n'
                '   Possible are: batch_norm, instance_norm or none'
                .format(norm_type))

        self.affine = affine
        # At init PyTorch sets gamma=1, beta=0, so affine vs not is numerically
        # identical; we always carry the params through the kernel.
        self.gamma = jnp.ones((self.input_size,), jnp.float32)
        self.beta = jnp.zeros((self.input_size,), jnp.float32)

    # -- forward ------------------------------------------------------------
    def __call__(self, x):
        if self.norm_type == 'none':
            return self.batch_norm(x)
        if self.norm_type == 'batch_norm':
            return self._batch_norm(x)
        return self._instance_norm(x)

    # Batch norm: one group (row) per CHANNEL, reduce over batch + spatial.
    def _batch_norm(self, x):
        C = self.input_size
        if self.nary == 2:
            N, Cx, H, W = x.shape
            assert Cx == C
            x2 = jnp.transpose(x, (1, 0, 2, 3)).reshape(C, N * H * W)
            y2 = pallas_row_norm(x2, self.gamma, self.beta, self.eps)
            return jnp.transpose(y2.reshape(C, N, H, W), (1, 0, 2, 3))
        # nary == 1
        if x.ndim == 3:
            N, Cx, L = x.shape
            assert Cx == C
            x2 = jnp.transpose(x, (1, 0, 2)).reshape(C, N * L)
            y2 = pallas_row_norm(x2, self.gamma, self.beta, self.eps)
            return jnp.transpose(y2.reshape(C, N, L), (1, 0, 2))
        # [N, C]
        N, Cx = x.shape
        assert Cx == C
        y2 = pallas_row_norm(x.T, self.gamma, self.beta, self.eps)
        return y2.T

    # Instance norm: one group (row) per (sample, channel), reduce over spatial.
    def _instance_norm(self, x):
        C = self.input_size
        if self.nary == 2:
            N, Cx, H, W = x.shape
            assert Cx == C
            x2 = x.reshape(N * C, H * W)
        else:
            N, Cx, L = x.shape
            assert Cx == C
            x2 = x.reshape(N * C, L)
        gamma_rows = jnp.tile(self.gamma, (N,))
        beta_rows = jnp.tile(self.beta, (N,))
        y2 = pallas_row_norm(x2, gamma_rows, beta_rows, self.eps)
        return y2.reshape(x.shape)


# ---------------------------------------------------------------------------
# Self-test.
# ---------------------------------------------------------------------------
if __name__ == "__main__":
    key = jax.random.PRNGKey(0)
    k1, k2 = jax.random.split(key)

    N, C, H, W = 2, 4, 16, 16
    x = jax.random.normal(k1, (N, C, H, W), dtype=jnp.float32)
    eps = 1e-5

    # 1) norm_type='none' -> Identity pass-through (no kernel, zero copies).
    norm_none = Normalization('none', 2, C)
    y0 = jax.block_until_ready(norm_none(x))
    assert y0.shape == x.shape and y0.dtype == x.dtype
    assert bool(jnp.array_equal(y0, x))
    ident = Identity()
    y0b, lens0 = ident(x, jnp.array([16, 12], dtype=jnp.int32))
    assert bool(jnp.array_equal(y0b, x))

    # 2) batch_norm, nary=2 (per-channel stats over N,H,W).
    bn2 = Normalization('batch_norm', 2, C)
    y1 = jax.block_until_ready(bn2(x))
    m = x.mean(axis=(0, 2, 3), keepdims=True)
    v = ((x - m) ** 2).mean(axis=(0, 2, 3), keepdims=True)
    ref1 = (x - m) / jnp.sqrt(v + eps)
    assert y1.shape == x.shape
    assert float(jnp.max(jnp.abs(y1 - ref1))) < 1e-4

    # 3) instance_norm, nary=2 (per-(n,c) stats over H,W).
    in2 = Normalization('instance_norm', 2, C)
    y2 = jax.block_until_ready(in2(x))
    mi = x.mean(axis=(2, 3), keepdims=True)
    vi = ((x - mi) ** 2).mean(axis=(2, 3), keepdims=True)
    ref2 = (x - mi) / jnp.sqrt(vi + eps)
    assert float(jnp.max(jnp.abs(y2 - ref2))) < 1e-4

    # 4) batch_norm, nary=1 on [N, C, L].
    L = 8
    x1 = jax.random.normal(k2, (N, C, L), dtype=jnp.float32)
    bn1 = Normalization('batch_norm', 1, C)
    y3 = jax.block_until_ready(bn1(x1))
    m1 = x1.mean(axis=(0, 2), keepdims=True)
    v1 = ((x1 - m1) ** 2).mean(axis=(0, 2), keepdims=True)
    ref3 = (x1 - m1) / jnp.sqrt(v1 + eps)
    assert float(jnp.max(jnp.abs(y3 - ref3))) < 1e-4

    print("KERNEL_OK")
</pallas_src>

<mosaic_0001>
module attributes {stable_mosaic.version = 11 : i64} {
  func.func @_row_norm_kernel(%arg0: i32, %arg1: memref<4x512xf32, #tpu.memory_space<vmem>>, %arg2: memref<4x1xf32, #tpu.memory_space<vmem>>, %arg3: memref<4x1xf32, #tpu.memory_space<vmem>>, %arg4: memref<4x512xf32, #tpu.memory_space<vmem>>) attributes {dimension_semantics = [#tpu.dimension_semantics<parallel>], iteration_bounds = array<i64: 1>, scalar_prefetch = 0 : i64, scratch_operands = 0 : i64, tpu.core_type = #tpu.core_type<tc>, window_params = [{transform_indices = @transform_0, window_bounds = array<i64: 4, 512>}, {transform_indices = @transform_1, window_bounds = array<i64: 4, 1>}, {transform_indices = @transform_2, window_bounds = array<i64: 4, 1>}, {transform_indices = @transform_3, window_bounds = array<i64: 4, 512>}]} {
    %c0 = arith.constant 0 : index
    %c0_0 = arith.constant 0 : index
    %0 = vector.load %arg1[%c0, %c0_0] : memref<4x512xf32, #tpu.memory_space<vmem>>, vector<4x512xf32>
    %cst = arith.constant dense<0.000000e+00> : vector<4xf32>
    %1 = vector.multi_reduction <add>, %0, %cst [1] : vector<4x512xf32> to vector<4xf32>
    %2 = vector.shape_cast %1 : vector<4xf32> to vector<4x1xf32>
    %cst_1 = arith.constant 5.120000e+02 : f32
    %3 = vector.broadcast %cst_1 : f32 to vector<4x1xf32>
    %4 = arith.divf %2, %3 : vector<4x1xf32>
    %5 = vector.broadcast %4 : vector<4x1xf32> to vector<4x512xf32>
    %6 = arith.subf %0, %5 : vector<4x512xf32>
    %7 = arith.mulf %6, %6 : vector<4x512xf32>
    %cst_2 = arith.constant dense<0.000000e+00> : vector<4xf32>
    %8 = vector.multi_reduction <add>, %7, %cst_2 [1] : vector<4x512xf32> to vector<4xf32>
    %9 = vector.shape_cast %8 : vector<4xf32> to vector<4x1xf32>
    %cst_3 = arith.constant 5.120000e+02 : f32
    %10 = vector.broadcast %cst_3 : f32 to vector<4x1xf32>
    %11 = arith.divf %9, %10 : vector<4x1xf32>
    %cst_4 = arith.constant 9.99999974E-6 : f32
    %12 = vector.broadcast %cst_4 : f32 to vector<4x1xf32>
    %13 = arith.addf %11, %12 : vector<4x1xf32>
    %14 = math.rsqrt %13 : vector<4x1xf32>
    %15 = vector.broadcast %14 : vector<4x1xf32> to vector<4x512xf32>
    %16 = arith.mulf %6, %15 : vector<4x512xf32>
    %c0_5 = arith.constant 0 : index
    %c0_6 = arith.constant 0 : index
    %17 = vector.load %arg2[%c0_5, %c0_6] : memref<4x1xf32, #tpu.memory_space<vmem>>, vector<4x1xf32>
    %18 = vector.broadcast %17 : vector<4x1xf32> to vector<4x512xf32>
    %19 = arith.mulf %16, %18 : vector<4x512xf32>
    %c0_7 = arith.constant 0 : index
    %c0_8 = arith.constant 0 : index
    %20 = vector.load %arg3[%c0_7, %c0_8] : memref<4x1xf32, #tpu.memory_space<vmem>>, vector<4x1xf32>
    %21 = vector.broadcast %20 : vector<4x1xf32> to vector<4x512xf32>
    %22 = arith.addf %19, %21 : vector<4x512xf32>
    %c0_9 = arith.constant 0 : index
    %c0_10 = arith.constant 0 : index
    %23 = vector.load %arg4[%c0_9, %c0_10] : memref<4x512xf32, #tpu.memory_space<vmem>>, vector<4x512xf32>
    tpu.vector_store %arg4[%c0_9, %c0_10], %22 {strides = array<i32>} : memref<4x512xf32, #tpu.memory_space<vmem>>, vector<4x512xf32>,
    return
  }
  func.func @transform_0(%arg0: i32) -> (i32, i32) {
    %c0_i32 = arith.constant 0 : i32
    %c0_i32_0 = arith.constant 0 : i32
    return %arg0, %c0_i32 : i32, i32
  }
  func.func @transform_1(%arg0: i32) -> (i32, i32) {
    %c0_i32 = arith.constant 0 : i32
    %c0_i32_0 = arith.constant 0 : i32
    return %arg0, %c0_i32 : i32, i32
  }
  func.func @transform_2(%arg0: i32) -> (i32, i32) {
    %c0_i32 = arith.constant 0 : i32
    %c0_i32_0 = arith.constant 0 : i32
    return %arg0, %c0_i32 : i32, i32
  }
  func.func @transform_3(%arg0: i32) -> (i32, i32) {
    %c0_i32 = arith.constant 0 : i32
    %c0_i32_0 = arith.constant 0 : i32
    return %arg0, %c0_i32 : i32, i32
  }
}

</mosaic_0001>

<bundles_post_ra>
// kernel: tpu_custom_call.1
= control target key start
LH: loop header
LB: loop body
LE: loop exit
PB: predicated region body
PF: predicated region fallthrough
CT: control target
= control target key end

     0   :  { %8 = vsyncpa [#allocation3], 0  ;;  %s234_s0 = inlined_call_operand.hbm [shape: f32[4,512], index: 0, kind: input, shape index: {}]   ;;  %s235_s1 = inlined_call_operand.vmem [shape: f32[4,1], index: 1, kind: input, shape index: {}]   ;;  %s236_s2 = inlined_call_operand.vmem [shape: f32[4,1], index: 2, kind: input, shape index: {}]   ;;  %s237_s3 = inlined_call_operand.hbm [shape: f32[4,512], index: 3, kind: output, shape index: {}]  }
   0x1   :  { %9 = vsyncpa [#allocation4], 0  ;;  %s190_s12 = smov [#allocation2]  }
   0x2   :  { %s16_s13 = sshll.u32 %s190_s12, 4  ;;  %s17_s13 = int_to_ptr.vmem [resolvable:$true] %s16_s13 }
   0x3   :  { %s154_s14 = scalar_lea.vmem %s17_s13, 256  ;;  %p159_p1 = scmp.lt.s32.totalorder %s17_s13, %s17_s13 }
   0x4   :  { %p155_p0 = scmp.ne.s32.totalorder %s17_s13, %s154_s14  ;;  %p160_p2 = scmp.lt.s32.totalorder %s154_s14, %s154_s14 }
   0x6   :  { %p161_p3 = por %p160_p2, %p159_p1 }
   0x8   :  { %p162_p4 = pnand %p161_p3, %p155_p0 }
   0xa   :  { %165 = shalt.err (!%p162_p4)
}
   0xb   :  { %19 = dma.hbm_to_vmem [thread:$0]  %s234_s0, 256, %s17_s13, [#allocation3]  }
   0xc   :  { %186 = dma.done.wait [#allocation3], 256  }
   0xd   :  { %187 = vsyncadd [#allocation3], 4294967040  ;;  %vm35_vm0 = vcmask 1043456   ;;  %v27_v0 = vld [vmem:[#allocation2] sm:$0xff]  ;;  %v28_v1 = vld [vmem:[#allocation2 + $0x8] sm:$0xff]  ;;  %v191_v12 = vmov 0   ;;  %v51_v16 = vlaneseq }
   0xe   :  { %v31_v2 = vcombine.high %v27_v0, %v27_v0  ;;  %v32_v3 = vcombine.high %v28_v1, %v28_v1  ;;  %v36_v4 = vsel %vm35_vm0, %v27_v0, 0.0  ;;  %v39_v6 = vsel %vm35_vm0, %v28_v1, 0.0  ;;  %v89_v11 = vld [vmem:[%s235_s1] sm:$0xf]  ;;  %140 = vset.pattern.permute.xlu1 %v191_v12  ;;  %141 = vset.pattern.permute.xlu0 %v191_v12  ;;  %s193_s1 = smov [#allocation5]  }
   0xf   :  { %92 = vperm.xlu1 %140, %v89_v11   ;;  %v104_v13 = vld [vmem:[%s236_s2] sm:$0xf]  ;;  %v192_v14 = vmov 839922192   ;;  %v52_v18 = vshrl.u32 %v51_v16, 7  ;;  %s127_s2 = sshll.u32 %s193_s1, 4  ;;  %s128_s2 = int_to_ptr.vmem [resolvable:$true] %s127_s2 }
  0x10   :  { %v37_v5 = vsel %vm35_vm0, %v31_v2, 0.0  ;;  %v41_v8 = vsel %vm35_vm0, %v32_v3, 0.0  ;;  %v49_v15 = vunpack.c.l.s4 %v192_v14  ;;  %s166_s20 = scalar_lea.vmem %s128_s2, 256  ;;  %p171_p6 = scmp.lt.s32.totalorder %s128_s2, %s128_s2 }
  0x11   :  { %v38_v7 = vadd.f32 %v37_v5, %v36_v4  ;;  %p167_p5 = scmp.ne.s32.totalorder %s128_s2, %s166_s20  ;;  %p172_p7 = scmp.lt.s32.totalorder %s166_s20, %s166_s20 }
  0x12   :  { %v50_v17 = vunpack.c.0.s8 %v49_v15 }
  0x13   :  { %v40_v9 = vadd.f32 %v39_v6, %v38_v7  ;;  %107 = vperm.xlu1 %140, %v104_v13   ;;  %p173_p8 = por %p172_p7, %p171_p6 }
  0x14   :  { %v53_v19 = vsub.s32 %v50_v17, %v52_v18 }
  0x15   :  { %v42_v10 = vadd.f32 %v41_v8, %v40_v9  ;;  %p174_p9 = pnand %p173_p8, %p167_p5 }
  0x17   :  { %43 = vadd.xlane.f32.xlu0 %v42_v10 }
  0x8a   :  { %v93_v39 = vpop.permute.xlu1 %92 }
  0x8b   :  { %v100_v45 = vrot.slane %v93_v39, %v53_v19 }
  0x8e   :  { %v108_v42 = vpop.permute.xlu1 %107 }
  0x8f   :  { %v115_v48 = vrot.slane %v108_v42, %v53_v19 }
  0xa0   :  { %v44_v20 = vpop.xlane.xlu0 %43 }
  0xa1   :  { %v46_v21 = vmul.f32 0.001953125, %v44_v20 }
  0xa3   :  { %v54_v22 = vrot.slane %v46_v21, %v53_v19 }
  0xa5   :  { %v56_v23 = vsub.f32 %v27_v0, %v54_v22  ;;  %v57_v24 = vsub.f32 %v28_v1, %v54_v22 }
  0xa7   :  { %v58_v25 = vmul.f32 %v56_v23, %v56_v23  ;;  %v59_v26 = vmul.f32 %v57_v24, %v57_v24 }
  0xa9   :  { %v62_v27 = vcombine.high %v58_v25, %v58_v25  ;;  %v63_v28 = vcombine.high %v59_v26, %v59_v26  ;;  %v66_v29 = vsel %vm35_vm0, %v58_v25, 0.0  ;;  %v69_v32 = vsel %vm35_vm0, %v59_v26, 0.0 }
  0xab   :  { %v67_v30 = vsel %vm35_vm0, %v62_v27, 0.0  ;;  %v71_v34 = vsel %vm35_vm0, %v63_v28, 0.0 }
  0xac   :  { %v68_v31 = vadd.f32 %v67_v30, %v66_v29 }
  0xae   :  { %v70_v33 = vadd.f32 %v69_v32, %v68_v31 }
  0xb0   :  { %v72_v35 = vadd.f32 %v71_v34, %v70_v33 }
  0xb2   :  { %73 = vadd.xlane.f32.xlu0 %v72_v35 }
 0x13b   :  { %v74_v36 = vpop.xlane.xlu0 %73 }
 0x13c   :  { %v75_v37 = vmul.f32 0.001953125, %v74_v36 }
 0x13e   :  { %v76_v38 = vadd.f32 1e-05, %v75_v37 }
 0x140   :  { %144 = vrsqrt.f32 %v76_v38 }
 0x14d   :  { %v145_v40 = vpop.eup %144 }
 0x14e   :  { %v85_v41 = vrot.slane %v145_v40, %v53_v19 }
 0x150   :  { %v87_v43 = vmul.f32 %v85_v41, %v56_v23  ;;  %v88_v44 = vmul.f32 %v85_v41, %v57_v24 }
 0x152   :  { %v102_v46 = vmul.f32 %v100_v45, %v87_v43  ;;  %v103_v47 = vmul.f32 %v100_v45, %v88_v44 }
 0x154   :  { %v117_v49 = vadd.f32 %v115_v48, %v102_v46  ;;  %v118_v50 = vadd.f32 %v115_v48, %v103_v47 }
 0x156   :  { %119 = vst [vmem:[#allocation5] sm:$0xff] %v117_v49  ;;  %120 = vst [vmem:[#allocation5 + $0x8] sm:$0xff] %v118_v50 }
 0x157   :  { %177 = shalt.err (!%p174_p9)
}
 0x158   :  { %130 = dma.vmem_to_hbm [thread:$0]  %s128_s2, 256, %s237_s3, [#allocation4]  }
 0x159   :  { %188 = dma.done.wait [#allocation4], 256  }
 0x15a   :  { %189 = vsyncadd [#allocation4], 4294967040 }
 0x15b   :  { %134 = vsyncpa [#allocation3], 1 }
 0x15c   :  { %135 = vsyncpa [#allocation4], 1 }

</bundles_post_ra>
